<compile_context>
chip_gen: v6e
topology: v6e:2x2x1
jax: 0.10.0
libtpu: 0.0.40
codegen_flags: <defaults>
</compile_context>

<pallas_src>
import jax
import jax.numpy as jnp
from jax.experimental import pallas as pl
from jax.experimental.pallas import tpu as pltpu

IN_DIM = 28 * 28          # 784 (equals the full K dim of x2d -> valid block dim)
H_PAD = 512               # hidden 500 padded to a lane-dense multiple of 128


def _round_up(n, m):
    return ((n + m - 1) // m) * m


def mlp_kernel(x_ref, w_ref, b_ref, o_ref):
    # Cast the x tile to bf16 in-kernel (fused; no separate XLA cast pass over x),
    # single bf16 x bf16 MXU matmul with f32 accumulation, f32 bias add, f32 store.
    x_bf = x_ref[...].astype(jnp.bfloat16)
    o_ref[...] = jnp.dot(x_bf, w_ref[...],
                         preferred_element_type=jnp.float32) + b_ref[...]


def prepare_params(params):
    """One-time parameter glue (do NOT call per forward).

    Folds fc1..fc4 (torch (out,in) layout) into a single affine map in float32,
    zero-pads the output dim 500 -> 512 (lane-dense), casts the folded weight to
    bf16, keeps the folded bias in f32 as (1, 512).
    """
    W1, b1 = params["fc1"]
    W2, b2 = params["fc2"]
    W3, b3 = params["fc3"]
    W4, b4 = params["fc4"]

    W1t = jnp.asarray(W1, jnp.float32).T   # (784, 500)
    W2t = jnp.asarray(W2, jnp.float32).T   # (500, 500)
    W3t = jnp.asarray(W3, jnp.float32).T
    W4t = jnp.asarray(W4, jnp.float32).T
    b1 = jnp.asarray(b1, jnp.float32)
    b2 = jnp.asarray(b2, jnp.float32)
    b3 = jnp.asarray(b3, jnp.float32)
    b4 = jnp.asarray(b4, jnp.float32)

    # Fold in float32; only the final effective weight is cast to bf16.
    W_eff = W1t @ W2t @ W3t @ W4t                           # (784, 500) f32
    b_eff = ((b1 @ W2t + b2) @ W3t + b3) @ W4t + b4         # (500,)     f32
    out_features = W_eff.shape[1]

    W_pad = jnp.zeros((IN_DIM, H_PAD), jnp.float32).at[:, :out_features].set(W_eff)
    b_pad = jnp.zeros((1, H_PAD), jnp.float32).at[0, :out_features].set(b_eff)
    return W_pad.astype(jnp.bfloat16), b_pad, out_features


def my_mlp_forward(x, prepared):
    """x: (B, 28, 28, C) float32; prepared: output of prepare_params()."""
    w_eff, b_eff, out_features = prepared

    # Mirror the PyTorch reshape(-1, 784) exactly; keep f32 (cast fused in-kernel).
    x2d = x.reshape(-1, IN_DIM).astype(jnp.float32)
    B = x2d.shape[0]

    # Batch tile: cap at 512 (amortizes grid-step overhead, fits VMEM everywhere),
    # aim for >= 2 tiles on moderate batches (v7x has 2 TensorCores), round tiny
    # batches up to 16 (native bf16 sublane tile).
    TM = min(512, max(16, _round_up(pl.cdiv(B, 2), 16)))
    n_tiles = pl.cdiv(B, TM)
    B_pad = n_tiles * TM
    if B_pad != B:
        x2d = jnp.pad(x2d, ((0, B_pad - B), (0, 0)))

    flops = 2 * B_pad * IN_DIM * H_PAD
    bytes_accessed = (B_pad * IN_DIM * 4          # x (f32)
                      + IN_DIM * H_PAD * 2        # folded weight (bf16)
                      + H_PAD * 4                 # folded bias (f32)
                      + B_pad * H_PAD * 4)        # out (f32)

    const = lambda i: (0, 0)   # weight / bias stay VMEM-resident across the grid
    grid_spec = pltpu.PrefetchScalarGridSpec(
        num_scalar_prefetch=0,
        grid=(n_tiles,),
        in_specs=[
            pl.BlockSpec((TM, IN_DIM), lambda i: (i, 0)),   # x tile (f32)
            pl.BlockSpec((IN_DIM, H_PAD), const),           # folded weight (bf16)
            pl.BlockSpec((1, H_PAD), const),                # folded bias (f32)
        ],
        out_specs=pl.BlockSpec((TM, H_PAD), lambda i: (i, 0)),
    )

    out_pad = pl.pallas_call(
        mlp_kernel,
        out_shape=jax.ShapeDtypeStruct((B_pad, H_PAD), jnp.float32),
        grid_spec=grid_spec,
        compiler_params=pltpu.CompilerParams(
            dimension_semantics=("parallel",),
            vmem_limit_bytes=32 * 1024 * 1024),
        cost_estimate=pl.CostEstimate(
            flops=flops, transcendentals=0, bytes_accessed=bytes_accessed),
    )(x2d, w_eff, b_eff)

    return out_pad[:B, :out_features]


def init_params(key, hidden_size):
    """Deterministic PyTorch-style init: U(-1/sqrt(fan_in), 1/sqrt(fan_in)); torch layout."""
    dims = [(IN_DIM, hidden_size),
            (hidden_size, hidden_size),
            (hidden_size, hidden_size),
            (hidden_size, hidden_size)]
    params = {}
    for i, (fan_in, fan_out) in enumerate(dims, start=1):
        key, kw, kb = jax.random.split(key, 3)
        bound = 1.0 / (fan_in ** 0.5)
        W = jax.random.uniform(kw, (fan_out, fan_in), jnp.float32, -bound, bound)
        b = jax.random.uniform(kb, (fan_out,), jnp.float32, -bound, bound)
        params[f"fc{i}"] = (W, b)
    return params


if __name__ == "__main__":
    hidden_size = 500
    num_classes = 10  # present in the module __init__ but unused by its forward

    key = jax.random.PRNGKey(0)
    key, kx = jax.random.split(key)

    # Small example input consistent with the forward's reshape: (B, 28, 28, 1).
    batch = 2
    x = jax.random.normal(kx, (batch, 28, 28, 1), jnp.float32)

    params = init_params(key, hidden_size)
    prepared = prepare_params(params)   # one-time fold / transpose / pad / bf16 cast

    out = my_mlp_forward(x, prepared)
    out = jax.block_until_ready(out)

    # Sanity check against a plain-JAX f32 reference of the same (unfolded) forward.
    # Tolerance covers the single bf16 rounding of x and the folded weight.
    x2d = x.reshape(-1, IN_DIM)
    ref = x2d
    for i in range(1, 5):
        W, b = params[f"fc{i}"]
        ref = ref @ W.T + b
    assert out.shape == (batch, hidden_size)
    assert jnp.allclose(out, ref, atol=2e-2, rtol=2e-2)

    print("KERNEL_OK")
</pallas_src>

<mosaic_0001>
module attributes {stable_mosaic.version = 11 : i64} {
  func.func @mlp_kernel(%arg0: i32, %arg1: memref<16x784xf32, #tpu.memory_space<vmem>>, %arg2: memref<784x512xbf16, #tpu.memory_space<vmem>>, %arg3: memref<1x512xf32, #tpu.memory_space<vmem>>, %arg4: memref<16x512xf32, #tpu.memory_space<vmem>>) attributes {dimension_semantics = [#tpu.dimension_semantics<parallel>], iteration_bounds = array<i64: 1>, scalar_prefetch = 0 : i64, scratch_operands = 0 : i64, tpu.core_type = #tpu.core_type<tc>, window_params = [{transform_indices = @transform_0, window_bounds = array<i64: 16, 784>}, {pipeline_mode = #tpu.pipeline_mode<synchronous>, transform_indices = @transform_1, window_bounds = array<i64: 784, 512>}, {pipeline_mode = #tpu.pipeline_mode<synchronous>, transform_indices = @transform_2, window_bounds = array<i64: 1, 512>}, {transform_indices = @transform_3, window_bounds = array<i64: 16, 512>}]} {
    %c0 = arith.constant 0 : index
    %c0_0 = arith.constant 0 : index
    %0 = vector.load %arg1[%c0, %c0_0] : memref<16x784xf32, #tpu.memory_space<vmem>>, vector<16x784xf32>
    %1 = arith.truncf %0 : vector<16x784xf32> to vector<16x784xbf16>
    %c0_1 = arith.constant 0 : index
    %c0_2 = arith.constant 0 : index
    %2 = vector.load %arg2[%c0_1, %c0_2] : memref<784x512xbf16, #tpu.memory_space<vmem>>, vector<784x512xbf16>
    %cst = arith.constant dense<0.000000e+00> : vector<16x512xf32>
    %3 = tpu.matmul %1, %2, %cst {dimension_numbers = #tpu.dot_dimension_numbers<[1], [0], [0], [1], [0, 0, 1, 1], [], []>} : vector<16x784xbf16>, vector<784x512xbf16>, vector<16x512xf32> -> vector<16x512xf32>
    %c0_3 = arith.constant 0 : index
    %c0_4 = arith.constant 0 : index
    %4 = vector.load %arg3[%c0_3, %c0_4] : memref<1x512xf32, #tpu.memory_space<vmem>>, vector<1x512xf32>
    %5 = vector.broadcast %4 : vector<1x512xf32> to vector<16x512xf32>
    %6 = arith.addf %3, %5 : vector<16x512xf32>
    %c0_5 = arith.constant 0 : index
    %c0_6 = arith.constant 0 : index
    %7 = vector.load %arg4[%c0_5, %c0_6] : memref<16x512xf32, #tpu.memory_space<vmem>>, vector<16x512xf32>
    tpu.vector_store %arg4[%c0_5, %c0_6], %6 {strides = array<i32>} : memref<16x512xf32, #tpu.memory_space<vmem>>, vector<16x512xf32>,
    return
  }
  func.func @transform_0(%arg0: i32) -> (i32, i32) {
    %c0_i32 = arith.constant 0 : i32
    %c0_i32_0 = arith.constant 0 : i32
    return %arg0, %c0_i32 : i32, i32
  }
  func.func @transform_1(%arg0: i32) -> (i32, i32) {
    %c0_i32 = arith.constant 0 : i32
    %c0_i32_0 = arith.constant 0 : i32
    %c0_i32_1 = arith.constant 0 : i32
    return %c0_i32, %c0_i32_0 : i32, i32
  }
  func.func @transform_2(%arg0: i32) -> (i32, i32) {
    %c0_i32 = arith.constant 0 : i32
    %c0_i32_0 = arith.constant 0 : i32
    %c0_i32_1 = arith.constant 0 : i32
    return %c0_i32, %c0_i32_0 : i32, i32
  }
  func.func @transform_3(%arg0: i32) -> (i32, i32) {
    %c0_i32 = arith.constant 0 : i32
    %c0_i32_0 = arith.constant 0 : i32
    return %arg0, %c0_i32 : i32, i32
  }
}

</mosaic_0001>

<bundles_post_ra>
// kernel: tpu_custom_call.1
= control target key start
LH: loop header
LB: loop body
LE: loop exit
PB: predicated region body
PF: predicated region fallthrough
CT: control target
= control target key end

     0   :  { %8 = vsyncpa [#allocation3], 0  ;;  %s2312_s0 = inlined_call_operand.hbm [shape: f32[16,784], index: 0, kind: input, shape index: {}]   ;;  %s2313_s1 = inlined_call_operand.hbm [shape: bf16[784,512], index: 1, kind: input, shape index: {}]   ;;  %s2314_s2 = inlined_call_operand.hbm [shape: f32[1,512], index: 2, kind: input, shape index: {}]   ;;  %s2315_s3 = inlined_call_operand.hbm [shape: f32[16,512], index: 3, kind: output, shape index: {}]  }
   0x1   :  { %9 = vsyncpa [#allocation6], 0 }
   0x2   :  { %10 = vsyncpa [#allocation4], 0  ;;  %s2237_s12 = smov [#allocation5]  }
   0x3   :  { %s28_s13 = sshll.u32 %s2237_s12, 4  ;;  %s29_s13 = int_to_ptr.vmem [resolvable:$true] %s28_s13 }
   0x4   :  { %s2159_s14 = scalar_lea.vmem %s29_s13, 25088  ;;  %p2164_p1 = scmp.lt.s32.totalorder %s29_s13, %s29_s13 }
   0x5   :  { %p2160_p0 = scmp.ne.s32.totalorder %s29_s13, %s2159_s14  ;;  %p2165_p2 = scmp.lt.s32.totalorder %s2159_s14, %s2159_s14 }
   0x7   :  { %p2166_p3 = por %p2165_p2, %p2164_p1 }
   0x9   :  { %p2167_p4 = pnand %p2166_p3, %p2160_p0 }
   0xb   :  { %2170 = shalt.err (!%p2167_p4)
}
   0xc   :  { %s2238_s15 = smov 256   ;;  %s2239_s16 = smov 16  }
   0xd   :  { %34 = dma.hbm_to_vmem [thread:$0]  %s2313_s1, 25088, %s29_s13, [#allocation6], %s2238_s15, %s2238_s15, %s2239_s16  }
   0xe   :  { %s2240_s19 = smov [#allocation2]  }
   0xf   :  { %s16_s20 = sshll.u32 %s2240_s19, 4  ;;  %s17_s20 = int_to_ptr.vmem [resolvable:$true] %s16_s20 }
  0x10   :  { %s2179_s21 = scalar_lea.vmem %s17_s20, 1792  ;;  %p2184_p6 = scmp.lt.s32.totalorder %s17_s20, %s17_s20 }
  0x11   :  { %p2180_p5 = scmp.ne.s32.totalorder %s17_s20, %s2179_s21  ;;  %p2185_p7 = scmp.lt.s32.totalorder %s2179_s21, %s2179_s21 }
  0x13   :  { %p2186_p8 = por %p2185_p7, %p2184_p6 }
  0x15   :  { %p2187_p9 = pnand %p2186_p8, %p2180_p5 }
  0x17   :  { %2190 = shalt.err (!%p2187_p9)
}
  0x18   :  { %s2241_s22 = smov 896   ;;  %s2242_s23 = smov 56  }
  0x19   :  { %22 = dma.hbm_to_vmem [thread:$0]  %s2312_s0, 1792, %s17_s20, [#allocation3], %s2241_s22, %s2241_s22, %s2242_s23  }
  0x1a   :  { %s2243_s26 = smov [#allocation7]  }
  0x1b   :  { %s41_s27 = sshll.u32 %s2243_s26, 4  ;;  %s42_s27 = int_to_ptr.vmem [resolvable:$true] %s41_s27 }
  0x1c   :  { %s2199_s1 = scalar_lea.vmem %s42_s27, 64  ;;  %p2204_p11 = scmp.lt.s32.totalorder %s42_s27, %s42_s27 }
  0x1d   :  { %p2200_p10 = scmp.ne.s32.totalorder %s42_s27, %s2199_s1  ;;  %p2205_p12 = scmp.lt.s32.totalorder %s2199_s1, %s2199_s1 }
  0x1f   :  { %p2206_p13 = por %p2205_p12, %p2204_p11 }
  0x21   :  { %p2207_p0 = pnand %p2206_p13, %p2200_p10 }
  0x23   :  { %2210 = shalt.err (!%p2207_p0)
}
  0x24   :  { %44 = dma.hbm_to_vmem [thread:$0]  %s2314_s2, 64, %s42_s27, [#allocation6]  }
  0x25   :  { %2231 = dma.done.wait [#allocation3], 1792  }
  0x26   :  { %2232 = vsyncadd [#allocation3], 4294965504 }
  0x27   :  { %2233 = dma.done.wait [#allocation6], 25152  }
  0x28   :  { %2234 = vsyncadd [#allocation6], 4294942144  ;;  %v1857_v0 = vld [vmem:[#allocation5 + $0xe4] ss:$16 sps:$4 sm:$0xff]   ;;  %v1861_v2 = vld [vmem:[#allocation5 + $0xe0] ss:$16 sps:$4 sm:$0xff]  }
  0x29   :  { %v1859_v1 = vld [vmem:[#allocation5 + $0x2e4] ss:$16 sps:$4 sm:$0xff]   ;;  %1278 = vmatprep.subr.bf16.mxu0 %v1857_v0  ;;  %v1862_v3 = vld [vmem:[#allocation5 + $0x2e0] ss:$16 sps:$4 sm:$0xff]   ;;  %v56_v46 = vld [vmem:[#allocation2 + $0x8] sm:$0xff]  ;;  %vm1274_vm0 = vcmask 130048  }
  0x2a   :  { %1321 = vmatprep.subr.bf16.mxu1 %v1859_v1  ;;  %v1863_v4 = vld [vmem:[#allocation5 + $0xc4] ss:$16 sps:$4 sm:$0xff]   ;;  %1279 = vmatpush1.bf16.msra.mxu0 %v1861_v2  ;;  %v1867_v6 = vld [vmem:[#allocation5 + $0xc0] ss:$16 sps:$4 sm:$0xff]   ;;  %v58_v48 = vld [vmem:[#allocation2 + $0x18] sm:$0xff]  ;;  %s2245_s0 = smov [#allocation8]  }
  0x2b   :  { %1322 = vmatpush1.bf16.msra.mxu1 %v1862_v3  ;;  %v1865_v5 = vld [vmem:[#allocation5 + $0x2c4] ss:$16 sps:$4 sm:$0xff]   ;;  %1280 = vmatprep.subr.bf16.mxu0 %v1863_v4  ;;  %v1868_v7 = vld [vmem:[#allocation5 + $0x2c0] ss:$16 sps:$4 sm:$0xff]   ;;  %s1635_s2 = sshll.u32 %s2245_s0, 4  ;;  %s1636_s2 = int_to_ptr.vmem [resolvable:$true] %s1635_s2 }
  0x2c   :  { %1323 = vmatprep.subr.bf16.mxu1 %v1865_v5  ;;  %v1869_v8 = vld [vmem:[#allocation5 + $0xa4] ss:$16 sps:$4 sm:$0xff]   ;;  %v1873_v10 = vld [vmem:[#allocation5 + $0xa0] ss:$16 sps:$4 sm:$0xff]   ;;  %s2211_s30 = scalar_lea.vmem %s1636_s2, 1024  ;;  %p2216_p2 = scmp.lt.s32.totalorder %s1636_s2, %s1636_s2 }
  0x2d   :  { %v1871_v9 = vld [vmem:[#allocation5 + $0x2a4] ss:$16 sps:$4 sm:$0xff]   ;;  %v1874_v11 = vld [vmem:[#allocation5 + $0x2a0] ss:$16 sps:$4 sm:$0xff]   ;;  %p2212_p1 = scmp.ne.s32.totalorder %s1636_s2, %s2211_s30  ;;  %p2217_p3 = scmp.lt.s32.totalorder %s2211_s30, %s2211_s30 }
  0x2e   :  { %1281 = vmatpush1.bf16.msra.mxu0 %v1867_v6  ;;  %v1875_v12 = vld [vmem:[#allocation5 + $0x84] ss:$16 sps:$4 sm:$0xff]   ;;  %v1879_v14 = vld [vmem:[#allocation5 + $0x80] ss:$16 sps:$4 sm:$0xff]  }
  0x2f   :  { %1324 = vmatpush1.bf16.msra.mxu1 %v1868_v7  ;;  %1282 = vmatprep.subr.bf16.mxu0 %v1869_v8  ;;  %v1877_v13 = vld [vmem:[#allocation5 + $0x284] ss:$16 sps:$4 sm:$0xff]   ;;  %v1880_v15 = vld [vmem:[#allocation5 + $0x280] ss:$16 sps:$4 sm:$0xff]   ;;  %v62_v7 = vld [vmem:[#allocation2 + $0x38] sm:$0xff]  ;;  %p2218_p4 = por %p2217_p3, %p2216_p2 }
  0x30   :  { %1325 = vmatprep.subr.bf16.mxu1 %v1871_v9  ;;  %v1881_v16 = vld [vmem:[#allocation5 + $0x64] ss:$16 sps:$4 sm:$0xff]   ;;  %v1885_v18 = vld [vmem:[#allocation5 + $0x60] ss:$16 sps:$4 sm:$0xff]   ;;  %v64_v9 = vld [vmem:[#allocation2 + $0x48] sm:$0xff] }
  0x31   :  { %v1883_v17 = vld [vmem:[#allocation5 + $0x264] ss:$16 sps:$4 sm:$0xff]   ;;  %v1886_v19 = vld [vmem:[#allocation5 + $0x260] ss:$16 sps:$4 sm:$0xff]   ;;  %p2219_p5 = pnand %p2218_p4, %p2212_p1 }
  0x32   :  { %1283 = vmatpush1.bf16.msra.mxu0 %v1873_v10  ;;  %v1887_v20 = vld [vmem:[#allocation5 + $0x44] ss:$16 sps:$4 sm:$0xff]   ;;  %v1891_v22 = vld [vmem:[#allocation5 + $0x40] ss:$16 sps:$4 sm:$0xff]  }
  0x33   :  { %1326 = vmatpush1.bf16.msra.mxu1 %v1874_v11  ;;  %1284 = vmatprep.subr.bf16.mxu0 %v1875_v12  ;;  %v1889_v21 = vld [vmem:[#allocation5 + $0x244] ss:$16 sps:$4 sm:$0xff]   ;;  %v1892_v23 = vld [vmem:[#allocation5 + $0x240] ss:$16 sps:$4 sm:$0xff]  }
  0x34   :  { %1327 = vmatprep.subr.bf16.mxu1 %v1877_v13  ;;  %v1893_v24 = vld [vmem:[#allocation5 + $0x24] ss:$16 sps:$4 sm:$0xff]   ;;  %v1897_v26 = vld [vmem:[#allocation5 + $0x20] ss:$16 sps:$4 sm:$0xff]  }
  0x35   :  { %v1895_v25 = vld [vmem:[#allocation5 + $0x224] ss:$16 sps:$4 sm:$0xff]   ;;  %v1898_v27 = vld [vmem:[#allocation5 + $0x220] ss:$16 sps:$4 sm:$0xff]  }
  0x36   :  { %1285 = vmatpush1.bf16.msra.mxu0 %v1879_v14  ;;  %v1899_v28 = vld [vmem:[#allocation5 + $0x4] ss:$16 sps:$4 sm:$0xff]   ;;  %v1903_v30 = vld [vmem:[#allocation5] ss:$16 sps:$4 sm:$0xff]  }
  0x37   :  { %1328 = vmatpush1.bf16.msra.mxu1 %v1880_v15  ;;  %1286 = vmatprep.subr.bf16.mxu0 %v1881_v16  ;;  %v1901_v29 = vld [vmem:[#allocation5 + $0x204] ss:$16 sps:$4 sm:$0xff]   ;;  %v1904_v31 = vld [vmem:[#allocation5 + $0x200] ss:$16 sps:$4 sm:$0xff]  }
  0x38   :  { %1329 = vmatprep.subr.bf16.mxu1 %v1883_v17  ;;  %v1905_v32 = vld [vmem:[#allocation5 + $0x1e4] ss:$16 sps:$4 sm:$0xff]   ;;  %v1909_v34 = vld [vmem:[#allocation5 + $0x1e0] ss:$16 sps:$4 sm:$0xff]   ;;  %v1964_v17 = vld [vmem:[#allocation5 + $0xec] ss:$16 sps:$4 sm:$0xff]  }
  0x39   :  { %v1907_v33 = vld [vmem:[#allocation5 + $0x3e4] ss:$16 sps:$4 sm:$0xff]   ;;  %v1910_v35 = vld [vmem:[#allocation5 + $0x3e0] ss:$16 sps:$4 sm:$0xff]  }
  0x3a   :  { %1287 = vmatpush1.bf16.msra.mxu0 %v1885_v18  ;;  %v1911_v36 = vld [vmem:[#allocation5 + $0x1c4] ss:$16 sps:$4 sm:$0xff]   ;;  %v1915_v38 = vld [vmem:[#allocation5 + $0x1c0] ss:$16 sps:$4 sm:$0xff]  }
  0x3b   :  { %1330 = vmatpush1.bf16.msra.mxu1 %v1886_v19  ;;  %1288 = vmatprep.subr.bf16.mxu0 %v1887_v20  ;;  %v1913_v37 = vld [vmem:[#allocation5 + $0x3c4] ss:$16 sps:$4 sm:$0xff]   ;;  %v1916_v39 = vld [vmem:[#allocation5 + $0x3c0] ss:$16 sps:$4 sm:$0xff]   ;;  %v68_v20 = vld [vmem:[#allocation2 + $0x68] sm:$0xff] }
  0x3c   :  { %1331 = vmatprep.subr.bf16.mxu1 %v1889_v21  ;;  %v1917_v40 = vld [vmem:[#allocation5 + $0x1a4] ss:$16 sps:$4 sm:$0xff]   ;;  %v1921_v42 = vld [vmem:[#allocation5 + $0x1a0] ss:$16 sps:$4 sm:$0xff]   ;;  %v2244_v21 = vmov 0  }
  0x3d   :  { %v1919_v41 = vld [vmem:[#allocation5 + $0x3a4] ss:$16 sps:$4 sm:$0xff]   ;;  %v1922_v43 = vld [vmem:[#allocation5 + $0x3a0] ss:$16 sps:$4 sm:$0xff]  }
  0x3e   :  { %1289 = vmatpush1.bf16.msra.mxu0 %v1891_v22  ;;  %v1923_v44 = vld [vmem:[#allocation5 + $0x184] ss:$16 sps:$4 sm:$0xff]   ;;  %v1927_v50 = vld [vmem:[#allocation5 + $0x180] ss:$16 sps:$4 sm:$0xff]  }
  0x3f   :  { %1332 = vmatpush1.bf16.msra.mxu1 %v1892_v23  ;;  %1290 = vmatprep.subr.bf16.mxu0 %v1893_v24  ;;  %v1925_v45 = vld [vmem:[#allocation5 + $0x384] ss:$16 sps:$4 sm:$0xff]   ;;  %v1928_v51 = vld [vmem:[#allocation5 + $0x380] ss:$16 sps:$4 sm:$0xff]   ;;  %v1962_v24 = vld [vmem:[#allocation5 + $0xe8] ss:$16 sps:$4 sm:$0xff]  }
  0x40   :  { %1333 = vmatprep.subr.bf16.mxu1 %v1895_v25  ;;  %v63_v47 = vld [vmem:[#allocation2 + $0x40] sm:$0xff]  ;;  %v65_v49 = vld [vmem:[#allocation2 + $0x50] sm:$0xff] }
  0x41   :  { %v1929_v52 = vld [vmem:[#allocation5 + $0x164] ss:$16 sps:$4 sm:$0xff]   ;;  %v2277_v53 = vpack.c.bf16 %v63_v47, %v56_v46  ;;  %v2279_v54 = vpack.c.bf16 %v65_v49, %v58_v48  ;;  %v1933_v56 = vld [vmem:[#allocation5 + $0x160] ss:$16 sps:$4 sm:$0xff]   ;;  %v1992_v47 = vld [vmem:[#allocation5 + $0x48] ss:$16 sps:$4 sm:$0xff]  }
  0x42   :  { %1291 = vmatpush1.bf16.msra.mxu0 %v1897_v26  ;;  %v1931_v55 = vld [vmem:[#allocation5 + $0x364] ss:$16 sps:$4 sm:$0xff]   ;;  %v1934_v57 = vld [vmem:[#allocation5 + $0x360] ss:$16 sps:$4 sm:$0xff]   ;;  %v1970_v26 = vld [vmem:[#allocation5 + $0xcc] ss:$16 sps:$4 sm:$0xff]  }
  0x43   :  { %1334 = vmatpush1.bf16.msra.mxu1 %v1898_v27  ;;  %1292 = vmatprep.subr.bf16.mxu0 %v1899_v28  ;;  %v1935_v58 = vld [vmem:[#allocation5 + $0x144] ss:$16 sps:$4 sm:$0xff]   ;;  %v1939_v60 = vld [vmem:[#allocation5 + $0x140] ss:$16 sps:$4 sm:$0xff]   ;;  %v1968_v28 = vld [vmem:[#allocation5 + $0xc8] ss:$16 sps:$4 sm:$0xff]  }
  0x44   :  { %1335 = vmatprep.subr.bf16.mxu1 %v1901_v29  ;;  %1310 = vmatprep.mubr.bf16.mxu0 %v2277_v53  ;;  %v1937_v59 = vld [vmem:[#allocation5 + $0x344] ss:$16 sps:$4 sm:$0xff]   ;;  %v1940_v61 = vld [vmem:[#allocation5 + $0x340] ss:$16 sps:$4 sm:$0xff]   ;;  %v2000_v49 = vld [vmem:[#allocation5 + $0x2c] ss:$16 sps:$4 sm:$0xff]  }
  0x45   :  { %1353 = vmatprep.mubr.bf16.mxu1 %v2279_v54  ;;  %v1941_v62 = vld [vmem:[#allocation5 + $0x124] ss:$16 sps:$4 sm:$0xff]   ;;  %v1945_v0 = vld [vmem:[#allocation5 + $0x120] ss:$16 sps:$4 sm:$0xff]  }
  0x46   :  { %1293 = vmatpush1.bf16.msra.mxu0 %v1903_v30  ;;  %v1943_v63 = vld [vmem:[#allocation5 + $0x324] ss:$16 sps:$4 sm:$0xff]   ;;  %v1946_v1 = vld [vmem:[#allocation5 + $0x320] ss:$16 sps:$4 sm:$0xff]   ;;  %v1976_v30 = vld [vmem:[#allocation5 + $0xac] ss:$16 sps:$4 sm:$0xff]  }
  0x47   :  { %1336 = vmatpush1.bf16.msra.mxu1 %v1904_v31  ;;  %1294 = vmatprep.subr.bf16.mxu0 %v1905_v32  ;;  %v1947_v2 = vld [vmem:[#allocation5 + $0x104] ss:$16 sps:$4 sm:$0xff]   ;;  %v1951_v4 = vld [vmem:[#allocation5 + $0x100] ss:$16 sps:$4 sm:$0xff]   ;;  %v1974_v32 = vld [vmem:[#allocation5 + $0xa8] ss:$16 sps:$4 sm:$0xff]  }
  0x48   :  { %1337 = vmatprep.subr.bf16.mxu1 %v1907_v33  ;;  %v1949_v3 = vld [vmem:[#allocation5 + $0x304] ss:$16 sps:$4 sm:$0xff]   ;;  %v1952_v5 = vld [vmem:[#allocation5 + $0x300] ss:$16 sps:$4 sm:$0xff]  }
  0x49   :  { %v55_v6 = vld [vmem:[#allocation2] sm:$0xff]  ;;  %v57_v8 = vld [vmem:[#allocation2 + $0x10] sm:$0xff] }
  0x4a   :  { %1295 = vmatpush2.bf16.msra.mxu0 %v1909_v34  ;;  %v1955_v10 = vld [vmem:[#allocation5 + $0x4e4] ss:$16 sps:$4 sm:$0xff]   ;;  %v2283_v12 = vpack.c.bf16 %v62_v7, %v55_v6  ;;  %v2285_v13 = vpack.c.bf16 %v64_v9, %v57_v8  ;;  %v1953_v14 = vld [vmem:[#allocation5 + $0x4e0] ss:$16 sps:$4 sm:$0xff]   ;;  %v1982_v34 = vld [vmem:[#allocation5 + $0x8c] ss:$16 sps:$4 sm:$0xff]  }
  0x4b   :  { %1338 = vmatpush2.bf16.msra.mxu1 %v1910_v35  ;;  %1296 = vmatprep.subr.bf16.mxu0 %v1911_v36  ;;  %v1958_v11 = vld [vmem:[#allocation5 + $0x604] ss:$16 sps:$4 sm:$0xff]   ;;  %v1956_v15 = vld [vmem:[#allocation5 + $0x600] ss:$16 sps:$4 sm:$0xff]   ;;  %v1980_v36 = vld [vmem:[#allocation5 + $0x88] ss:$16 sps:$4 sm:$0xff]  }
  0x4c   :  { %1339 = vmatprep.subr.bf16.mxu1 %v1913_v37  ;;  %v1961_v16 = vld [vmem:[#allocation5 + $0x4c4] ss:$16 sps:$4 sm:$0xff]   ;;  %v1959_v18 = vld [vmem:[#allocation5 + $0x4c0] ss:$16 sps:$4 sm:$0xff]   ;;  %v2030_v6 = vld [vmem:[#allocation5 + $0x18c] ss:$16 sps:$4 sm:$0xff]  }
  0x4d   :  { %v61_v19 = vld [vmem:[#allocation2 + $0x30] sm:$0xff]  ;;  %v2028_v8 = vld [vmem:[#allocation5 + $0x188] ss:$16 sps:$4 sm:$0xff]  }
  0x4e   :  { %1297 = vmatpush2.bf16.msra.mxu0 %v1915_v38  ;;  %v1967_v22 = vld [vmem:[#allocation5 + $0x4a4] ss:$16 sps:$4 sm:$0xff]   ;;  %v2290_v23 = vpack.c.bf16 %v68_v20, %v61_v19  ;;  %v1965_v25 = vld [vmem:[#allocation5 + $0x4a0] ss:$16 sps:$4 sm:$0xff]   ;;  %v1988_v38 = vld [vmem:[#allocation5 + $0x6c] ss:$16 sps:$4 sm:$0xff]  }
  0x4f   :  { %1340 = vmatpush2.bf16.msra.mxu1 %v1916_v39  ;;  %1298 = vmatprep.subr.bf16.mxu0 %v1917_v40  ;;  %v1973_v27 = vld [vmem:[#allocation5 + $0x484] ss:$16 sps:$4 sm:$0xff]   ;;  %v1971_v29 = vld [vmem:[#allocation5 + $0x480] ss:$16 sps:$4 sm:$0xff]   ;;  %v1986_v40 = vld [vmem:[#allocation5 + $0x68] ss:$16 sps:$4 sm:$0xff]  }
  0x50   :  { %1341 = vmatprep.subr.bf16.mxu1 %v1919_v41  ;;  %v1979_v31 = vld [vmem:[#allocation5 + $0x464] ss:$16 sps:$4 sm:$0xff]   ;;  %v1977_v33 = vld [vmem:[#allocation5 + $0x460] ss:$16 sps:$4 sm:$0xff]   ;;  %v60_v41 = vld [vmem:[#allocation2 + $0x28] sm:$0xff] }
  0x51   :  { %v1985_v35 = vld [vmem:[#allocation5 + $0x444] ss:$16 sps:$4 sm:$0xff]   ;;  %v1983_v37 = vld [vmem:[#allocation5 + $0x440] ss:$16 sps:$4 sm:$0xff]  }
  0x52   :  { %1299 = vmatpush2.bf16.msra.mxu0 %v1921_v42  ;;  %v1991_v39 = vld [vmem:[#allocation5 + $0x424] ss:$16 sps:$4 sm:$0xff]   ;;  %v1995_v48 = vld [vmem:[#allocation5 + $0x400] ss:$16 sps:$4 sm:$0xff]  }
  0x53   :  { %1342 = vmatpush2.bf16.msra.mxu1 %v1922_v43  ;;  %1300 = vmatprep.subr.bf16.mxu0 %v1923_v44  ;;  %v67_v42 = vld [vmem:[#allocation2 + $0x60] sm:$0xff] }
  0x54   :  { %1343 = vmatprep.subr.bf16.mxu1 %v1925_v45  ;;  %v1989_v43 = vld [vmem:[#allocation5 + $0x420] ss:$16 sps:$4 sm:$0xff]   ;;  %v2295_v44 = vpack.c.bf16 %v67_v42, %v60_v41  ;;  %v1994_v45 = vld [vmem:[#allocation5 + $0x4c] ss:$16 sps:$4 sm:$0xff]   ;;  %v1997_v46 = vld [vmem:[#allocation5 + $0x404] ss:$16 sps:$4 sm:$0xff]  }
  0x55   :  { %v2033_v7 = vld [vmem:[#allocation5 + $0x544] ss:$16 sps:$4 sm:$0xff]   ;;  %v2031_v9 = vld [vmem:[#allocation5 + $0x540] ss:$16 sps:$4 sm:$0xff]   ;;  %v2072_v41 = vld [vmem:[#allocation5 + $0x4ac] ss:$16 sps:$4 sm:$0xff]  }
  0x56   :  { %1301 = vmatpush2.bf16.msra.mxu0 %v1927_v50  ;;  %v2003_v50 = vld [vmem:[#allocation5 + $0x5e4] ss:$16 sps:$4 sm:$0xff]   ;;  %v2043_v19 = vld [vmem:[#allocation5 + $0x500] ss:$16 sps:$4 sm:$0xff]   ;;  %v2075_v42 = vld [vmem:[#allocation5 + $0x26c] ss:$16 sps:$4 sm:$0xff]  }
  0x57   :  { %1344 = vmatpush2.bf16.msra.mxu1 %v1928_v51  ;;  %1302 = vmatprep.subr.bf16.mxu0 %v1929_v52  ;;  %v1998_v51 = vld [vmem:[#allocation5 + $0x28] ss:$16 sps:$4 sm:$0xff]   ;;  %v2001_v52 = vld [vmem:[#allocation5 + $0x5e0] ss:$16 sps:$4 sm:$0xff]  }
  0x58   :  { %1345 = vmatprep.subr.bf16.mxu1 %v1931_v55  ;;  %v2009_v55 = vld [vmem:[#allocation5 + $0x5c4] ss:$16 sps:$4 sm:$0xff]  }
  0x59   :  { %v59_v20 = vld [vmem:[#allocation2 + $0x20] sm:$0xff] }
  0x5a   :  { %1303 = vmatpush2.bf16.msra.mxu0 %v1933_v56  ;;  %v2004_v56 = vld [vmem:[#allocation5 + $0x8] ss:$16 sps:$4 sm:$0xff]  }
  0x5b   :  { %1346 = vmatpush2.bf16.msra.mxu1 %v1934_v57  ;;  %1304 = vmatprep.subr.bf16.mxu0 %v1935_v58  ;;  %v2007_v57 = vld [vmem:[#allocation5 + $0x5c0] ss:$16 sps:$4 sm:$0xff]   ;;  %v2012_v58 = vld [vmem:[#allocation5 + $0x1ec] ss:$16 sps:$4 sm:$0xff]  }
  0x5c   :  { %1347 = vmatprep.subr.bf16.mxu1 %v1937_v59  ;;  %v2015_v59 = vld [vmem:[#allocation5 + $0x5a4] ss:$16 sps:$4 sm:$0xff]  }
  0x5e   :  { %1305 = vmatpush2.bf16.msra.mxu0 %v1939_v60  ;;  %v2010_v60 = vld [vmem:[#allocation5 + $0x1e8] ss:$16 sps:$4 sm:$0xff]  }
  0x5f   :  { %1348 = vmatpush2.bf16.msra.mxu1 %v1940_v61  ;;  %1306 = vmatprep.subr.bf16.mxu0 %v1941_v62  ;;  %v2013_v61 = vld [vmem:[#allocation5 + $0x5a0] ss:$16 sps:$4 sm:$0xff]   ;;  %v2018_v62 = vld [vmem:[#allocation5 + $0x1cc] ss:$16 sps:$4 sm:$0xff]  }
  0x60   :  { %1349 = vmatprep.subr.bf16.mxu1 %v1943_v63  ;;  %v2021_v63 = vld [vmem:[#allocation5 + $0x584] ss:$16 sps:$4 sm:$0xff]  }
  0x62   :  { %1307 = vmatpush2.bf16.msra.mxu0 %v1945_v0  ;;  %v2016_v0 = vld [vmem:[#allocation5 + $0x1c8] ss:$16 sps:$4 sm:$0xff]  }
  0x63   :  { %1350 = vmatpush2.bf16.msra.mxu1 %v1946_v1  ;;  %1308 = vmatprep.subr.bf16.mxu0 %v1947_v2  ;;  %v2019_v1 = vld [vmem:[#allocation5 + $0x580] ss:$16 sps:$4 sm:$0xff]   ;;  %v2024_v2 = vld [vmem:[#allocation5 + $0x1ac] ss:$16 sps:$4 sm:$0xff]  }
  0x64   :  { %1351 = vmatprep.subr.bf16.mxu1 %v1949_v3  ;;  %v2027_v3 = vld [vmem:[#allocation5 + $0x564] ss:$16 sps:$4 sm:$0xff]  }
  0x66   :  { %1309 = vmatpush2.bf16.msra.mxu0 %v1951_v4  ;;  %v2022_v4 = vld [vmem:[#allocation5 + $0x1a8] ss:$16 sps:$4 sm:$0xff]  }
  0x67   :  { %1352 = vmatpush2.bf16.msra.mxu1 %v1952_v5  ;;  %1364 = vmatprep.subr.bf16.mxu0 %v1955_v10  ;;  %v2025_v5 = vld [vmem:[#allocation5 + $0x560] ss:$16 sps:$4 sm:$0xff]   ;;  %v2036_v10 = vld [vmem:[#allocation5 + $0x16c] ss:$16 sps:$4 sm:$0xff]  }
  0x68   :  { %1421 = vmatprep.subr.bf16.mxu1 %v1958_v11  ;;  %v2039_v11 = vld [vmem:[#allocation5 + $0x524] ss:$16 sps:$4 sm:$0xff]  }
  0x69   :  { %1311 = vmatmul.mubr.bf16.vlgmr.msra.gmra.mxu0 %v2283_v12 }
  0x6a   :  { %1354 = vmatmul.mubr.bf16.vlgmr.msra.gmra.mxu1 %v2285_v13  ;;  %1365 = vmatpush1.bf16.msra.mxu0 %v1953_v14  ;;  %v2034_v14 = vld [vmem:[#allocation5 + $0x168] ss:$16 sps:$4 sm:$0xff]  }
  0x6b   :  { %1422 = vmatpush1.bf16.msra.mxu1 %v1956_v15  ;;  %1366 = vmatprep.subr.bf16.mxu0 %v1961_v16  ;;  %v2037_v15 = vld [vmem:[#allocation5 + $0x520] ss:$16 sps:$4 sm:$0xff]   ;;  %v2042_v16 = vld [vmem:[#allocation5 + $0x14c] ss:$16 sps:$4 sm:$0xff]  }
  0x6c   :  { %1439 = vmatprep.mubr.bf16.mxu1 %v2244_v21  ;;  %1450 = vmatprep.subr.bf16.mxu1 %v1964_v17  ;;  %v2045_v17 = vld [vmem:[#allocation5 + $0x504] ss:$16 sps:$4 sm:$0xff]  }
  0x6d   :  { %1396 = vmatprep.mubr.bf16.mxu0 %v2295_v44 }
  0x6e   :  { %1367 = vmatpush1.bf16.msra.mxu0 %v1959_v18  ;;  %v2040_v18 = vld [vmem:[#allocation5 + $0x148] ss:$16 sps:$4 sm:$0xff]  }
  0x6f   :  { %1368 = vmatprep.subr.bf16.mxu0 %v1967_v22  ;;  %v66_v22 = vld [vmem:[#allocation2 + $0x58] sm:$0xff] }
  0x72   :  { %1844 = vmatmul.mubr.msk.bf16.vlgmr.msra.gmra.mxu1 %vm1274_vm0, %v2290_v23  ;;  %1369 = vmatpush1.bf16.msra.mxu0 %v1965_v25  ;;  %v2051_v25 = vld [vmem:[#allocation5 + $0x2ec] ss:$16 sps:$4 sm:$0xff]  }
  0x73   :  { %1451 = vmatpush1.bf16.msra.mxu1 %v1962_v24  ;;  %1370 = vmatprep.subr.bf16.mxu0 %v1973_v27  ;;  %v2048_v24 = vld [vmem:[#allocation5 + $0x12c] ss:$16 sps:$4 sm:$0xff]   ;;  %v2046_v27 = vld [vmem:[#allocation5 + $0x128] ss:$16 sps:$4 sm:$0xff]  }
  0x74   :  { %1452 = vmatprep.subr.bf16.mxu1 %v1970_v26  ;;  %1482 = vmatprep.mubr.bf16.mxu1 %v2277_v53  ;;  %v2006_v53 = vld [vmem:[#allocation5 + $0xc] ss:$16 sps:$4 sm:$0xff]   ;;  %v2298_v26 = vpack.c.bf16 %v66_v22, %v59_v20  ;;  %v2130_v20 = vld [vmem:[#allocation5 + $0x568] ss:$16 sps:$4 sm:$0xff]  }
  0x75   :  { %v2133_v22 = vld [vmem:[#allocation5 + $0x328] ss:$16 sps:$4 sm:$0xff]  }
  0x76   :  { %1371 = vmatpush1.bf16.msra.mxu0 %v1971_v29  ;;  %v2054_v29 = vld [vmem:[#allocation5 + $0x10c] ss:$16 sps:$4 sm:$0xff]  }
  0x77   :  { %1453 = vmatpush1.bf16.msra.mxu1 %v1968_v28  ;;  %1372 = vmatprep.subr.bf16.mxu0 %v1979_v31  ;;  %v2049_v28 = vld [vmem:[#allocation5 + $0x2e8] ss:$16 sps:$4 sm:$0xff]  }
  0x78   :  { %1454 = vmatprep.subr.bf16.mxu1 %v1976_v30  ;;  %v2057_v30 = vld [vmem:[#allocation5 + $0x2cc] ss:$16 sps:$4 sm:$0xff]   ;;  %v2052_v31 = vld [vmem:[#allocation5 + $0x108] ss:$16 sps:$4 sm:$0xff]  }
  0x7a   :  { %1373 = vmatpush1.bf16.msra.mxu0 %v1977_v33  ;;  %v2060_v33 = vld [vmem:[#allocation5 + $0x4ec] ss:$16 sps:$4 sm:$0xff]  }
  0x7b   :  { %1455 = vmatpush1.bf16.msra.mxu1 %v1974_v32  ;;  %1374 = vmatprep.subr.bf16.mxu0 %v1985_v35  ;;  %v2055_v32 = vld [vmem:[#allocation5 + $0x2c8] ss:$16 sps:$4 sm:$0xff]  }
  0x7c   :  { %1456 = vmatprep.subr.bf16.mxu1 %v1982_v34  ;;  %v2063_v34 = vld [vmem:[#allocation5 + $0x2ac] ss:$16 sps:$4 sm:$0xff]   ;;  %v2058_v35 = vld [vmem:[#allocation5 + $0x4e8] ss:$16 sps:$4 sm:$0xff]  }
  0x7e   :  { %1375 = vmatpush1.bf16.msra.mxu0 %v1983_v37  ;;  %v2066_v37 = vld [vmem:[#allocation5 + $0x4cc] ss:$16 sps:$4 sm:$0xff]  }
  0x7f   :  { %1457 = vmatpush1.bf16.msra.mxu1 %v1980_v36  ;;  %1376 = vmatprep.subr.bf16.mxu0 %v1991_v39  ;;  %v2061_v36 = vld [vmem:[#allocation5 + $0x2a8] ss:$16 sps:$4 sm:$0xff]  }
  0x80   :  { %1458 = vmatprep.subr.bf16.mxu1 %v1988_v38  ;;  %v2069_v38 = vld [vmem:[#allocation5 + $0x28c] ss:$16 sps:$4 sm:$0xff]   ;;  %v2064_v39 = vld [vmem:[#allocation5 + $0x4c8] ss:$16 sps:$4 sm:$0xff]  }
  0x82   :  { %1377 = vmatpush1.bf16.msra.mxu0 %v1989_v43  ;;  %v2073_v43 = vld [vmem:[#allocation5 + $0x268] ss:$16 sps:$4 sm:$0xff]  }
  0x83   :  { %1459 = vmatpush1.bf16.msra.mxu1 %v1986_v40  ;;  %1378 = vmatprep.subr.bf16.mxu0 %v1997_v46  ;;  %v2067_v40 = vld [vmem:[#allocation5 + $0x288] ss:$16 sps:$4 sm:$0xff]   ;;  %v2081_v46 = vld [vmem:[#allocation5 + $0x24c] ss:$16 sps:$4 sm:$0xff]  }
  0x84   :  { %1460 = vmatprep.subr.bf16.mxu1 %v1994_v45  ;;  %v2078_v45 = vld [vmem:[#allocation5 + $0x48c] ss:$16 sps:$4 sm:$0xff]  }
  0x86   :  { %1379 = vmatpush1.bf16.msra.mxu0 %v1995_v48  ;;  %v2084_v48 = vld [vmem:[#allocation5 + $0x46c] ss:$16 sps:$4 sm:$0xff]  }
  0x87   :  { %1461 = vmatpush1.bf16.msra.mxu1 %v1992_v47  ;;  %1380 = vmatprep.subr.bf16.mxu0 %v2003_v50  ;;  %v2079_v47 = vld [vmem:[#allocation5 + $0x248] ss:$16 sps:$4 sm:$0xff]  }
  0x88   :  { %1462 = vmatprep.subr.bf16.mxu1 %v2000_v49  ;;  %v2087_v49 = vld [vmem:[#allocation5 + $0x22c] ss:$16 sps:$4 sm:$0xff]   ;;  %v2082_v50 = vld [vmem:[#allocation5 + $0x468] ss:$16 sps:$4 sm:$0xff]  }
  0x8a   :  { %1381 = vmatpush2.bf16.msra.mxu0 %v2001_v52  ;;  %v2093_v52 = vld [vmem:[#allocation5 + $0x20c] ss:$16 sps:$4 sm:$0xff]  }
  0x8b   :  { %1463 = vmatpush1.bf16.msra.mxu1 %v1998_v51  ;;  %1382 = vmatprep.subr.bf16.mxu0 %v2009_v55  ;;  %v2090_v51 = vld [vmem:[#allocation5 + $0x44c] ss:$16 sps:$4 sm:$0xff]   ;;  %v2091_v55 = vld [vmem:[#allocation5 + $0x208] ss:$16 sps:$4 sm:$0xff]  }
  0x8c   :  { %1464 = vmatprep.subr.bf16.mxu1 %v2006_v53  ;;  %v2088_v53 = vld [vmem:[#allocation5 + $0x448] ss:$16 sps:$4 sm:$0xff]  }
  0x8e   :  { %1383 = vmatpush2.bf16.msra.mxu0 %v2007_v57  ;;  %v2099_v57 = vld [vmem:[#allocation5 + $0x3ec] ss:$16 sps:$4 sm:$0xff]  }
  0x8f   :  { %1465 = vmatpush1.bf16.msra.mxu1 %v2004_v56  ;;  %1384 = vmatprep.subr.bf16.mxu0 %v2015_v59  ;;  %v2096_v56 = vld [vmem:[#allocation5 + $0x42c] ss:$16 sps:$4 sm:$0xff]   ;;  %v2097_v59 = vld [vmem:[#allocation5 + $0x3e8] ss:$16 sps:$4 sm:$0xff]  }
  0x90   :  { %1466 = vmatprep.subr.bf16.mxu1 %v2012_v58  ;;  %v2094_v58 = vld [vmem:[#allocation5 + $0x428] ss:$16 sps:$4 sm:$0xff]  }
  0x92   :  { %1385 = vmatpush2.bf16.msra.mxu0 %v2013_v61  ;;  %v2105_v61 = vld [vmem:[#allocation5 + $0x3cc] ss:$16 sps:$4 sm:$0xff]  }
  0x93   :  { %1467 = vmatpush2.bf16.msra.mxu1 %v2010_v60  ;;  %1386 = vmatprep.subr.bf16.mxu0 %v2021_v63  ;;  %v2102_v60 = vld [vmem:[#allocation5 + $0x40c] ss:$16 sps:$4 sm:$0xff]   ;;  %v2103_v63 = vld [vmem:[#allocation5 + $0x3c8] ss:$16 sps:$4 sm:$0xff]  }
  0x94   :  { %1468 = vmatprep.subr.bf16.mxu1 %v2018_v62  ;;  %v2100_v62 = vld [vmem:[#allocation5 + $0x408] ss:$16 sps:$4 sm:$0xff]  }
  0x96   :  { %1387 = vmatpush2.bf16.msra.mxu0 %v2019_v1  ;;  %v2111_v1 = vld [vmem:[#allocation5 + $0x3ac] ss:$16 sps:$4 sm:$0xff]  }
  0x97   :  { %1469 = vmatpush2.bf16.msra.mxu1 %v2016_v0  ;;  %1388 = vmatprep.subr.bf16.mxu0 %v2027_v3  ;;  %v2108_v0 = vld [vmem:[#allocation5 + $0x5ec] ss:$16 sps:$4 sm:$0xff]   ;;  %v2109_v3 = vld [vmem:[#allocation5 + $0x3a8] ss:$16 sps:$4 sm:$0xff]  }
  0x98   :  { %1470 = vmatprep.subr.bf16.mxu1 %v2024_v2  ;;  %v2106_v2 = vld [vmem:[#allocation5 + $0x5e8] ss:$16 sps:$4 sm:$0xff]  }
  0x9a   :  { %1389 = vmatpush2.bf16.msra.mxu0 %v2025_v5  ;;  %v2117_v5 = vld [vmem:[#allocation5 + $0x38c] ss:$16 sps:$4 sm:$0xff]  }
  0x9b   :  { %1471 = vmatpush2.bf16.msra.mxu1 %v2022_v4  ;;  %1390 = vmatprep.subr.bf16.mxu0 %v2033_v7  ;;  %v2114_v4 = vld [vmem:[#allocation5 + $0x5cc] ss:$16 sps:$4 sm:$0xff]   ;;  %v2115_v7 = vld [vmem:[#allocation5 + $0x388] ss:$16 sps:$4 sm:$0xff]  }
  0x9c   :  { %1472 = vmatprep.subr.bf16.mxu1 %v2030_v6  ;;  %v2112_v6 = vld [vmem:[#allocation5 + $0x5c8] ss:$16 sps:$4 sm:$0xff]  }
  0x9e   :  { %1391 = vmatpush2.bf16.msra.mxu0 %v2031_v9  ;;  %v2123_v9 = vld [vmem:[#allocation5 + $0x36c] ss:$16 sps:$4 sm:$0xff]  }
  0x9f   :  { %1473 = vmatpush2.bf16.msra.mxu1 %v2028_v8  ;;  %1392 = vmatprep.subr.bf16.mxu0 %v2039_v11  ;;  %v2120_v8 = vld [vmem:[#allocation5 + $0x5ac] ss:$16 sps:$4 sm:$0xff]   ;;  %v2121_v11 = vld [vmem:[#allocation5 + $0x368] ss:$16 sps:$4 sm:$0xff]  }
  0xa0   :  { %1474 = vmatprep.subr.bf16.mxu1 %v2036_v10  ;;  %v2118_v10 = vld [vmem:[#allocation5 + $0x5a8] ss:$16 sps:$4 sm:$0xff]  }
  0xa2   :  { %1393 = vmatpush2.bf16.msra.mxu0 %v2037_v15  ;;  %v2129_v15 = vld [vmem:[#allocation5 + $0x34c] ss:$16 sps:$4 sm:$0xff]  }
  0xa3   :  { %1475 = vmatpush2.bf16.msra.mxu1 %v2034_v14  ;;  %1394 = vmatprep.subr.bf16.mxu0 %v2045_v17  ;;  %v2126_v14 = vld [vmem:[#allocation5 + $0x58c] ss:$16 sps:$4 sm:$0xff]   ;;  %v2127_v17 = vld [vmem:[#allocation5 + $0x348] ss:$16 sps:$4 sm:$0xff]  }
  0xa4   :  { %1476 = vmatprep.subr.bf16.mxu1 %v2042_v16  ;;  %v2124_v16 = vld [vmem:[#allocation5 + $0x588] ss:$16 sps:$4 sm:$0xff]  }
  0xa6   :  { %1395 = vmatpush2.bf16.msra.mxu0 %v2043_v19  ;;  %v2135_v19 = vld [vmem:[#allocation5 + $0x32c] ss:$16 sps:$4 sm:$0xff]  }
  0xa7   :  { %1477 = vmatpush2.bf16.msra.mxu1 %v2040_v18  ;;  %1493 = vmatprep.subr.bf16.mxu0 %v2051_v25  ;;  %v2132_v18 = vld [vmem:[#allocation5 + $0x56c] ss:$16 sps:$4 sm:$0xff]  }
  0xa8   :  { %1478 = vmatprep.subr.bf16.mxu1 %v2048_v24  ;;  %v2138_v24 = vld [vmem:[#allocation5 + $0x54c] ss:$16 sps:$4 sm:$0xff]  }
  0xa9   :  { %1397 = vmatmul.mubr.bf16.vlgmr.msra.gmra.mxu0 %v2298_v26  ;;  %v2141_v25 = vld [vmem:[#allocation5 + $0x30c] ss:$16 sps:$4 sm:$0xff]  }
  0xaa   :  { %1494 = vmatpush1.bf16.msra.mxu0 %v2049_v28  ;;  %1525 = vmatprep.mubr.bf16.mxu0 %v2279_v54  ;;  %v2070_v54 = vld [vmem:[#allocation5 + $0x4a8] ss:$16 sps:$4 sm:$0xff]  }
  0xab   :  { %1479 = vmatpush2.bf16.msra.mxu1 %v2046_v27  ;;  %1495 = vmatprep.subr.bf16.mxu0 %v2057_v30  ;;  %v2136_v27 = vld [vmem:[#allocation5 + $0x548] ss:$16 sps:$4 sm:$0xff]   ;;  %v2147_v30 = vld [vmem:[#allocation5 + $0x60c] ss:$16 sps:$4 sm:$0xff]  }
  0xac   :  { %1480 = vmatprep.subr.bf16.mxu1 %v2054_v29  ;;  %v2139_v28 = vld [vmem:[#allocation5 + $0x308] ss:$16 sps:$4 sm:$0xff]   ;;  %v2144_v29 = vld [vmem:[#allocation5 + $0x52c] ss:$16 sps:$4 sm:$0xff]  }
  0xae   :  { %1496 = vmatpush1.bf16.msra.mxu0 %v2055_v32  ;;  %v2145_v32 = vld [vmem:[#allocation5 + $0x608] ss:$16 sps:$4 sm:$0xff]  }
  0xaf   :  { %1481 = vmatpush2.bf16.msra.mxu1 %v2052_v31  ;;  %1497 = vmatprep.subr.bf16.mxu0 %v2063_v34  ;;  %v2142_v31 = vld [vmem:[#allocation5 + $0x528] ss:$16 sps:$4 sm:$0xff]  }
  0xb0   :  { %1536 = vmatprep.subr.bf16.mxu1 %v2060_v33  ;;  %v2150_v33 = vld [vmem:[#allocation5 + $0x50c] ss:$16 sps:$4 sm:$0xff]   ;;  %v2148_v34 = vld [vmem:[#allocation5 + $0x508] ss:$16 sps:$4 sm:$0xff]  }
  0xb2   :  { %1483 = vmatmul.mubr.bf16.vlgmr.msra.gmra.mxu1 %v2283_v12  ;;  %1498 = vmatpush1.bf16.msra.mxu0 %v2061_v36  ;;  %v2076_v12 = vld [vmem:[#allocation5 + $0x488] ss:$16 sps:$4 sm:$0xff]  }
  0xb3   :  { %1537 = vmatpush1.bf16.msra.mxu1 %v2058_v35  ;;  %1499 = vmatprep.subr.bf16.mxu0 %v2069_v38  ;;  %v274_v35 = vlaneseq }
  0xb4   :  { %1538 = vmatprep.subr.bf16.mxu1 %v2066_v37  ;;  %1568 = vmatprep.mubr.bf16.mxu1 %v2295_v44  ;;  %v2085_v44 = vld [vmem:[#allocation5 + $0x228] ss:$16 sps:$4 sm:$0xff]  }
  0xb5   :  { %v275_v37 = vshrl.u32 %v274_v35, 7 }
  0xb6   :  { %1500 = vmatpush1.bf16.msra.mxu0 %v2067_v40 }
  0xb7   :  { %1539 = vmatpush1.bf16.msra.mxu1 %v2064_v39  ;;  %1501 = vmatprep.subr.bf16.mxu0 %v2075_v42  ;;  %v276_v40 = vsub.s32 0, %v275_v37  ;;  %v280_v42 = vsub.s32 1, %v275_v37 }
  0xb8   :  { %1540 = vmatprep.subr.bf16.mxu1 %v2072_v41  ;;  %v272_v41 = vld [vmem:[#allocation7] sm:$0xf] }
  0xba   :  { %1502 = vmatpush1.bf16.msra.mxu0 %v2073_v43  ;;  %v277_v43 = vrot.slane %v272_v41, %v276_v40 }
  0xbb   :  { %1541 = vmatpush1.bf16.msra.mxu1 %v2070_v54  ;;  %1503 = vmatprep.subr.bf16.mxu0 %v2081_v46  ;;  %v281_v46 = vrot.slane %v272_v41, %v280_v42 }
  0xbc   :  { %1542 = vmatprep.subr.bf16.mxu1 %v2078_v45 }
  0xbe   :  { %1504 = vmatpush1.bf16.msra.mxu0 %v2079_v47 }
  0xbf   :  { %1543 = vmatpush1.bf16.msra.mxu1 %v2076_v12  ;;  %1505 = vmatprep.subr.bf16.mxu0 %v2087_v49 }
  0xc0   :  { %1544 = vmatprep.subr.bf16.mxu1 %v2084_v48 }
  0xc2   :  { %1506 = vmatpush1.bf16.msra.mxu0 %v2085_v44 }
  0xc3   :  { %1545 = vmatpush1.bf16.msra.mxu1 %v2082_v50  ;;  %1507 = vmatprep.subr.bf16.mxu0 %v2093_v52 }
  0xc4   :  { %1546 = vmatprep.subr.bf16.mxu1 %v2090_v51 }
  0xc6   :  { %1508 = vmatpush1.bf16.msra.mxu0 %v2091_v55 }
  0xc7   :  { %1547 = vmatpush1.bf16.msra.mxu1 %v2088_v53  ;;  %1509 = vmatprep.subr.bf16.mxu0 %v2099_v57 }
  0xc8   :  { %1548 = vmatprep.subr.bf16.mxu1 %v2096_v56 }
  0xca   :  { %1510 = vmatpush2.bf16.msra.mxu0 %v2097_v59 }
  0xcb   :  { %1549 = vmatpush1.bf16.msra.mxu1 %v2094_v58  ;;  %1511 = vmatprep.subr.bf16.mxu0 %v2105_v61 }
  0xcc   :  { %1550 = vmatprep.subr.bf16.mxu1 %v2102_v60 }
  0xce   :  { %1512 = vmatpush2.bf16.msra.mxu0 %v2103_v63 }
  0xcf   :  { %1551 = vmatpush1.bf16.msra.mxu1 %v2100_v62  ;;  %1513 = vmatprep.subr.bf16.mxu0 %v2111_v1 }
  0xd0   :  { %1552 = vmatprep.subr.bf16.mxu1 %v2108_v0 }
  0xd2   :  { %1514 = vmatpush2.bf16.msra.mxu0 %v2109_v3 }
  0xd3   :  { %1553 = vmatpush2.bf16.msra.mxu1 %v2106_v2  ;;  %1515 = vmatprep.subr.bf16.mxu0 %v2117_v5 }
  0xd4   :  { %1554 = vmatprep.subr.bf16.mxu1 %v2114_v4 }
  0xd6   :  { %1516 = vmatpush2.bf16.msra.mxu0 %v2115_v7 }
  0xd7   :  { %1555 = vmatpush2.bf16.msra.mxu1 %v2112_v6  ;;  %1517 = vmatprep.subr.bf16.mxu0 %v2123_v9  ;;  %v284_v6 = vsub.s32 2, %v275_v37 }
  0xd8   :  { %1556 = vmatprep.subr.bf16.mxu1 %v2120_v8  ;;  %v288_v8 = vsub.s32 3, %v275_v37 }
  0xda   :  { %1518 = vmatpush2.bf16.msra.mxu0 %v2121_v11 }
  0xdb   :  { %1557 = vmatpush2.bf16.msra.mxu1 %v2118_v10  ;;  %1519 = vmatprep.subr.bf16.mxu0 %v2129_v15  ;;  %v285_v10 = vrot.slane %v272_v41, %v284_v6  ;;  %v289_v15 = vrot.slane %v272_v41, %v288_v8 }
  0xdc   :  { %1558 = vmatprep.subr.bf16.mxu1 %v2126_v14 }
  0xde   :  { %1520 = vmatpush2.bf16.msra.mxu0 %v2127_v17 }
  0xdf   :  { %1559 = vmatpush2.bf16.msra.mxu1 %v2124_v16  ;;  %1521 = vmatprep.subr.bf16.mxu0 %v2135_v19 }
  0xe0   :  { %1560 = vmatprep.subr.bf16.mxu1 %v2132_v18 }
  0xe2   :  { %1522 = vmatpush2.bf16.msra.mxu0 %v2133_v22 }
  0xe3   :  { %1561 = vmatpush2.bf16.msra.mxu1 %v2130_v20  ;;  %1523 = vmatprep.subr.bf16.mxu0 %v2141_v25 }
  0xe4   :  { %1562 = vmatprep.subr.bf16.mxu1 %v2138_v24 }
  0xe6   :  { %1524 = vmatpush2.bf16.msra.mxu0 %v2139_v28 }
  0xe7   :  { %1563 = vmatpush2.bf16.msra.mxu1 %v2136_v27  ;;  %1593 = vmatprep.subr.bf16.mxu0 %v2147_v30 }
  0xe8   :  { %1564 = vmatprep.subr.bf16.mxu1 %v2144_v29 }
  0xe9   :  { %1526 = vmatmul.mubr.bf16.vlgmr.msra.gmra.mxu0 %v2285_v13 }
  0xea   :  { %1594 = vmatpush1.bf16.msra.mxu0 %v2145_v32  ;;  %1611 = vmatprep.mubr.bf16.mxu0 %v2244_v21 }
  0xeb   :  { %1565 = vmatpush2.bf16.msra.mxu1 %v2142_v31 }
  0xec   :  { %1566 = vmatprep.subr.bf16.mxu1 %v2150_v33 }
  0xef   :  { %1567 = vmatpush2.bf16.msra.mxu1 %v2148_v34 }
  0xf1   :  { %1845 = vmatmul.mubr.msk.bf16.vlgmr.msra.gmra.mxu0 %vm1274_vm0, %v2290_v23 }
  0xf2   :  { %1569 = vmatmul.mubr.bf16.vlgmr.msra.gmra.mxu1 %v2298_v26 }
 0x129   :  { %v1312_v39 = vpop.f32.mrf.mxu0 }
 0x12a   :  { %v1355_v36 = vpop.f32.mrf.mxu1  ;;  %v1313_v12 = vadd.f32 %v1312_v39, %v277_v43 }
 0x12b   :  { %v1314_v54 = vpop.f32.mrf.mxu0 }
 0x12c   :  { %v1357_v38 = vpop.f32.mrf.mxu1  ;;  %v1315_v26 = vadd.f32 %v1314_v54, %v281_v46  ;;  %v1356_v49 = vadd.f32 %v1355_v36, %v1313_v12 }
 0x12d   :  { %v1316_v21 = vpop.f32.mrf.mxu0 }
 0x12e   :  { %v1359_v13 = vpop.f32.mrf.mxu1  ;;  %v1317_v23 = vadd.f32 %v1316_v21, %v277_v43  ;;  %v1358_v51 = vadd.f32 %v1357_v38, %v1315_v26 }
 0x12f   :  { %v1318_v48 = vpop.f32.mrf.mxu0 }
 0x130   :  { %v1361_v45 = vpop.f32.mrf.mxu1  ;;  %v1319_v52 = vadd.f32 %v1318_v48, %v281_v46  ;;  %v1360_v56 = vadd.f32 %v1359_v13, %v1317_v23 }
 0x132   :  { %v1441_v47 = vpop.f32.mrf.mxu1  ;;  %v1362_v61 = vadd.f32 %v1361_v45, %v1319_v52 }
 0x134   :  { %v1443_v50 = vpop.f32.mrf.mxu1 }
 0x136   :  { %v1445_v59 = vpop.f32.mrf.mxu1 }
 0x138   :  { %v1447_v3 = vpop.f32.mrf.mxu1 }
 0x169   :  { %v1398_v44 = vpop.f32.mrf.mxu0 }
 0x16a   :  { %v1399_v53 = vadd.f32 %v1398_v44, %v1356_v49 }
 0x16b   :  { %v1400_v55 = vpop.f32.mrf.mxu0 }
 0x16c   :  { %v1442_v57 = vadd.f32 %v1441_v47, %v1399_v53  ;;  %v1401_v58 = vadd.f32 %v1400_v55, %v1358_v51 }
 0x16d   :  { %v1402_v60 = vpop.f32.mrf.mxu0 }
 0x16e   :  { %1622 = vst [vmem:[#allocation8] sm:$0xff] %v1442_v57  ;;  %v1444_v62 = vadd.f32 %v1443_v50, %v1401_v58  ;;  %v1403_v63 = vadd.f32 %v1402_v60, %v1360_v56 }
 0x16f   :  { %v1404_v0 = vpop.f32.mrf.mxu0 }
 0x170   :  { %1623 = vst [vmem:[#allocation8 + $0x8] sm:$0xff] %v1444_v62  ;;  %v1446_v1 = vadd.f32 %v1445_v59, %v1403_v63  ;;  %v1405_v2 = vadd.f32 %v1404_v0, %v1362_v61 }
 0x172   :  { %1626 = vst [vmem:[#allocation8 + $0x20] sm:$0xff] %v1446_v1  ;;  %v1448_v4 = vadd.f32 %v1447_v3, %v1405_v2  ;;  %v1484_v5 = vpop.f32.mrf.mxu1 }
 0x173   :  { %v1485_v17 = vadd.f32 %v1484_v5, %v285_v10 }
 0x174   :  { %1627 = vst [vmem:[#allocation8 + $0x28] sm:$0xff] %v1448_v4  ;;  %v1486_v7 = vpop.f32.mrf.mxu1 }
 0x175   :  { %v1487_v20 = vadd.f32 %v1486_v7, %v289_v15 }
 0x176   :  { %v1488_v11 = vpop.f32.mrf.mxu1 }
 0x177   :  { %v1489_v27 = vadd.f32 %v1488_v11, %v285_v10 }
 0x178   :  { %v1490_v18 = vpop.f32.mrf.mxu1 }
 0x179   :  { %v1491_v32 = vadd.f32 %v1490_v18, %v289_v15 }
 0x1a9   :  { %v1527_v9 = vpop.f32.mrf.mxu0 }
 0x1aa   :  { %v1528_v22 = vadd.f32 %v1527_v9, %v1485_v17 }
 0x1ab   :  { %v1529_v14 = vpop.f32.mrf.mxu0 }
 0x1ac   :  { %v1530_v28 = vadd.f32 %v1529_v14, %v1487_v20 }
 0x1ad   :  { %v1531_v16 = vpop.f32.mrf.mxu0 }
 0x1ae   :  { %v1532_v33 = vadd.f32 %v1531_v16, %v1489_v27 }
 0x1af   :  { %v1533_v19 = vpop.f32.mrf.mxu0 }
 0x1b0   :  { %v1534_v38 = vadd.f32 %v1533_v19, %v1491_v32 }
 0x1b1   :  { %v1613_v25 = vpop.f32.mrf.mxu0 }
 0x1b2   :  { %v1570_v24 = vpop.f32.mrf.mxu1 }
 0x1b3   :  { %v1571_v29 = vadd.f32 %v1570_v24, %v1528_v22  ;;  %v1615_v31 = vpop.f32.mrf.mxu0 }
 0x1b4   :  { %v1572_v30 = vpop.f32.mrf.mxu1 }
 0x1b5   :  { %v1614_v34 = vadd.f32 %v1613_v25, %v1571_v29  ;;  %v1573_v35 = vadd.f32 %v1572_v30, %v1530_v28  ;;  %v1617_v37 = vpop.f32.mrf.mxu0 }
 0x1b6   :  { %v1574_v36 = vpop.f32.mrf.mxu1 }
 0x1b7   :  { %1624 = vst [vmem:[#allocation8 + $0x10] sm:$0xff] %v1614_v34  ;;  %v1616_v39 = vadd.f32 %v1615_v31, %v1573_v35  ;;  %v1575_v40 = vadd.f32 %v1574_v36, %v1532_v33  ;;  %v1619_v13 = vpop.f32.mrf.mxu0 }
 0x1b8   :  { %v1576_v41 = vpop.f32.mrf.mxu1 }
 0x1b9   :  { %1625 = vst [vmem:[#allocation8 + $0x18] sm:$0xff] %v1616_v39  ;;  %v1618_v42 = vadd.f32 %v1617_v37, %v1575_v40  ;;  %v1577_v54 = vadd.f32 %v1576_v41, %v1534_v38 }
 0x1bb   :  { %1628 = vst [vmem:[#allocation8 + $0x30] sm:$0xff] %v1618_v42  ;;  %v1620_v43 = vadd.f32 %v1619_v13, %v1577_v54 }
 0x1bd   :  { %1629 = vst [vmem:[#allocation8 + $0x38] sm:$0xff] %v1620_v43 }
 0x1be   :  { %2222 = shalt.err (!%p2219_p5)
}
 0x1bf   :  { %s2246_s4 = smov 512   ;;  %s2247_s5 = smov 32  }
 0x1c0   :  { %1641 = dma.vmem_to_hbm [thread:$0]  %s1636_s2, 1024, %s2315_s3, [#allocation4], %s2246_s4, %s2246_s4, %s2247_s5  }
 0x1c1   :  { %2235 = dma.done.wait [#allocation4], 1024  }
 0x1c2   :  { %2236 = vsyncadd [#allocation4], 4294966272 }
 0x1c3   :  { %1645 = vsyncpa [#allocation3], 1 }
 0x1c4   :  { %1646 = vsyncpa [#allocation6], 1 }
 0x1c5   :  { %1647 = vsyncpa [#allocation4], 1 }

</bundles_post_ra>
